<compile_context>
chip_gen: v6e
topology: v6e:2x2x1
jax: 0.10.0
libtpu: 0.0.40
codegen_flags: <defaults>
</compile_context>

<pallas_src>
import functools

import numpy as np
import jax
import jax.numpy as jnp
from jax.experimental import pallas as pl
from jax.experimental.pallas import tpu as pltpu


# ----------------------------------------------------------------------------
# Bicubic interpolation matrices (host-side NumPy, cached per geometry)
# ----------------------------------------------------------------------------
def _cubic_kernel(s, A=-0.75):
    s = np.abs(s)
    return np.where(
        s <= 1.0,
        (A + 2.0) * s**3 - (A + 3.0) * s**2 + 1.0,
        np.where(s < 2.0, A * s**3 - 5.0 * A * s**2 + 8.0 * A * s - 4.0 * A, 0.0),
    )


def _bicubic_matrix(out_size: int, in_size: int) -> np.ndarray:
    """(out_size, in_size) matrix M s.t. y = M @ x is a 1-D bicubic resize.

    Matches torch bicubic with align_corners=False: src = (i+0.5)*scale - 0.5,
    4-tap Keys kernel (A=-0.75), border taps clamped (weights accumulate).
    """
    i = np.arange(out_size, dtype=np.float64)
    scale = in_size / out_size
    x = (i + 0.5) * scale - 0.5
    x0 = np.floor(x).astype(np.int64)
    t = x - x0
    M = np.zeros((out_size, in_size), dtype=np.float32)
    rows = np.arange(out_size)
    for k in range(-1, 3):
        idx = np.clip(x0 + k, 0, in_size - 1)
        w = _cubic_kernel(k - t).astype(np.float32)
        M[rows, idx] += w
    return M


@functools.lru_cache(maxsize=64)
def _cached_weights(H, W, C, max_size, new_h, new_w, pad_top, pad_left,
                    h_pad, out_cols):
    """Padded interpolation matrices, built once per geometry, kept on-device.

    Returns:
      wh_pad: (max_size, h_pad)  row-resize matrix; zero rows outside the
                                 vertical pad region, zero cols beyond H.
      b:      (W*C, out_cols)    column-resize matrix interleaved with I_C
                                 (Kronecker); zero cols beyond max_size*C and
                                 outside the horizontal pad region.
    """
    wh = _bicubic_matrix(new_h, H)                          # (new_h, H)
    wh_pad = np.zeros((max_size, h_pad), np.float32)
    wh_pad[pad_top:pad_top + new_h, :H] = wh

    ww = _bicubic_matrix(new_w, W)                          # (new_w, W)
    ww_pad = np.zeros((max_size, W), np.float32)
    ww_pad[pad_left:pad_left + new_w, :] = ww
    ww_pad_t = ww_pad.T                                     # (W, max_size)

    b = np.zeros((W * C, out_cols), np.float32)
    for c in range(C):
        # rows w*C + c, cols j*C + c  ->  B[w*C+c, j*C+c] = Ww_pad[j, w]
        b[c::C, c:max_size * C:C] = ww_pad_t
    # TODO(synk): drop the Kronecker-with-I_C inflation of B (C x FLOPs/bytes)
    # via a per-channel column pass if B's VMEM/DMA ever becomes the limiter.

    wh_dev = jax.device_put(jnp.asarray(wh_pad, jnp.bfloat16))
    b_dev = jax.device_put(jnp.asarray(b, jnp.bfloat16))
    return wh_dev, b_dev


def _vmem_budget_bytes() -> int:
    """~3/4 of physical VMEM: 96 MiB on v5e/v6e, 48 MiB on v7x."""
    try:
        cap = int(pltpu.get_tpu_info().vmem_capacity_bytes)
    except Exception:
        cap = 64 * 1024 * 1024          # conservative default (v7x physical)
    return (3 * cap) // 4


# ----------------------------------------------------------------------------
# Pallas kernel:  out = (Wh_pad @ X) @ B   with K (source rows) tiled.
# ----------------------------------------------------------------------------
_WC_CHUNK = 1024   # contraction chunk for the finalize matmul


def _resize_pad_kernel(wh_ref, x_ref, b_ref, out_ref, acc_ref, *,
                       H, tk, WC, C, max_size, fill,
                       pad_top, pad_left, new_h, new_w):
    k = pl.program_id(0)

    @pl.when(k == 0)
    def _init():
        acc_ref[...] = jnp.zeros_like(acc_ref)

    x = x_ref[...]
    if H % tk != 0:
        # Ragged last K tile: out-of-bounds rows of this block are undefined
        # (may contain NaN/Inf) — zero them explicitly before the dot.
        row = jax.lax.broadcasted_iota(jnp.int32, x.shape, 0)
        x = jnp.where(row < (H - k * tk), x, 0)
    x = x.astype(jnp.bfloat16)

    # Row resize, accumulated over K tiles of source rows (bf16 MXU, f32 acc).
    # Vertical padding is already folded into Wh (zero rows).
    acc_ref[...] += jnp.dot(wh_ref[...], x, preferred_element_type=jnp.float32)

    @pl.when(k == pl.num_programs(0) - 1)
    def _finalize():
        # Column resize + channel interleave.  The WC contraction is chunked
        # so only a (max_size, chunk) bf16 slab of the f32 accumulator is
        # materialized at a time (VMEM relief at the epilogue, esp. v7x).
        res = None
        for c0 in range(0, WC, _WC_CHUNK):
            c1 = min(c0 + _WC_CHUNK, WC)
            part = jnp.dot(acc_ref[:, c0:c1].astype(jnp.bfloat16),
                           b_ref[c0:c1, :],
                           preferred_element_type=jnp.float32)
            res = part if res is None else res + part

        if fill != 0:
            # Only needed for non-zero fill; pad region of `res` is exactly 0.
            rows = jax.lax.broadcasted_iota(jnp.int32, res.shape, 0)
            cols = jax.lax.broadcasted_iota(jnp.int32, res.shape, 1)
            j = cols // C
            inside = ((rows >= pad_top) & (rows < pad_top + new_h)
                      & (j >= pad_left) & (j < pad_left + new_w))
            res = jnp.where(inside, res, jnp.float32(fill))

        if jnp.issubdtype(out_ref.dtype, jnp.integer):
            # Round + clamp bicubic overshoot for integer images (torch-like).
            info = jnp.iinfo(out_ref.dtype)
            res = jnp.clip(jnp.round(res), info.min, info.max)

        out_ref[...] = res.astype(out_ref.dtype)


def resize_max_size(img_hwc: jnp.ndarray, max_size: int, fill: int = 0) -> jnp.ndarray:
    """Pallas implementation of ResizeMaxSize.forward for an HWC tensor.

    The image is kept in its source dtype (uint8/bf16/f32) — do NOT pre-cast
    narrow images to f32 before calling; the kernel is HBM-read-bound on X.
    """
    H, W, C = img_hwc.shape
    scale = max_size / float(max(H, W))
    if scale == 1.0:
        return img_hwc

    new_h = int(round(H * scale))
    new_w = int(round(W * scale))
    pad_top = (max_size - new_h) // 2
    pad_left = (max_size - new_w) // 2

    WC = W * C
    out_cols = -(-(max_size * C) // 128) * 128      # lane-dense output width
    x_itemsize = jnp.dtype(img_hwc.dtype).itemsize

    # ---- per-generation VMEM budget -> K tile size & vmem limit ----
    budget = _vmem_budget_bytes()
    b_bytes = WC * out_cols * 2                       # bf16 B, single-buffered
    acc_bytes = max_size * WC * 4                     # f32 accumulator scratch
    out_bytes = 2 * max_size * out_cols * x_itemsize  # output window
    headroom = 2 * 1024 * 1024
    per_row = 2 * (WC * x_itemsize + max_size * 2)    # dbl-buffered X + Wh tiles
    avail = budget - (b_bytes + acc_bytes + out_bytes + headroom)
    if avail < 128 * per_row:
        tk = 128
    else:
        tk = min(1024, (avail // per_row) // 128 * 128)
    if tk >= H:
        tk = H                                        # single K tile
    grid_k = -(-H // tk)
    h_pad = tk * grid_k   # Wh zero-padded to this width (tiny, host-side, cached)

    wh_pad, b = _cached_weights(H, W, C, max_size, new_h, new_w,
                                pad_top, pad_left, h_pad, out_cols)

    # Free view of contiguous HWC as (H, W*C).  No HBM padding copy of the
    # image — the ragged last K tile is masked inside the kernel.
    x_flat = jnp.reshape(img_hwc, (H, WC))

    kernel = functools.partial(
        _resize_pad_kernel, H=H, tk=tk, WC=WC, C=C, max_size=max_size,
        fill=fill, pad_top=pad_top, pad_left=pad_left, new_h=new_h, new_w=new_w)

    def _call(b_spec):
        return pl.pallas_call(
            kernel,
            out_shape=jax.ShapeDtypeStruct((max_size, out_cols), img_hwc.dtype),
            grid=(grid_k,),
            in_specs=[
                pl.BlockSpec((max_size, tk), lambda k: (0, k)),   # Wh K-tile
                pl.BlockSpec((tk, WC), lambda k: (k, 0)),         # image K-tile
                b_spec,                                           # B (invariant)
            ],
            out_specs=pl.BlockSpec((max_size, out_cols), lambda k: (0, 0)),
            scratch_shapes=[pltpu.VMEM((max_size, WC), jnp.float32)],
            compiler_params=pltpu.CompilerParams(
                # Single grid axis is a reduction over source rows.
                dimension_semantics=("arbitrary",),
                vmem_limit_bytes=int(budget),
            ),
        )(wh_pad, x_flat, b)

    try:
        # Loop-invariant B: request a single VMEM buffer (fetched once).
        out_flat = _call(pl.BlockSpec((WC, out_cols), lambda k: (0, 0),
                                      pipeline_mode=pl.Buffered(1)))
    except Exception:
        # Older/newer pallas builds without Buffered(1) support: default spec.
        out_flat = _call(pl.BlockSpec((WC, out_cols), lambda k: (0, 0)))

    # Drop the lane-padding columns; cheap on the small output.
    return out_flat[:, :max_size * C].reshape(max_size, max_size, C)


# ----------------------------------------------------------------------------
# Demo
# ----------------------------------------------------------------------------
if __name__ == "__main__":
    key = jax.random.PRNGKey(0)
    H, W, C = 16, 12, 4          # small HWC image
    MAX_SIZE = 24                # longer side (H=16) -> 24, W -> round(12*1.5)=18
    FILL = 0

    img = jax.random.uniform(key, (H, W, C), dtype=jnp.float32)

    out = resize_max_size(img, MAX_SIZE, fill=FILL)
    out = jax.block_until_ready(out)

    assert out.shape == (MAX_SIZE, MAX_SIZE, C), out.shape
    assert out.dtype == img.dtype

    # Pad region sanity check (left/right columns of width pad_w//2 == fill).
    new_h = int(round(H * (MAX_SIZE / max(H, W))))
    new_w = int(round(W * (MAX_SIZE / max(H, W))))
    pad_w = MAX_SIZE - new_w
    left = pad_w // 2
    assert bool(jnp.all(out[:, :left, :] == FILL))
    assert bool(jnp.all(out[:, MAX_SIZE - (pad_w - left):, :] == FILL))

    # Interior numerical check against an f32 NumPy reference (same bicubic
    # matrices); generous tolerance to account for bf16 MXU operands.
    wh_np = _bicubic_matrix(new_h, H)
    ww_np = _bicubic_matrix(new_w, W)
    ref = np.einsum("ah,hwc,bw->abc", wh_np, np.asarray(img, np.float32), ww_np)
    pad_top = (MAX_SIZE - new_h) // 2
    interior = np.asarray(out)[pad_top:pad_top + new_h, left:left + new_w, :]
    err = float(np.max(np.abs(interior - ref)))
    assert err < 5e-2, err

    # Second call with the same geometry hits the weight cache (no host
    # rebuild / re-upload of B) — also verifies determinism.
    out2 = jax.block_until_ready(resize_max_size(img, MAX_SIZE, fill=FILL))
    assert bool(jnp.all(out2 == out))

    print("KERNEL_OK")
</pallas_src>

<mosaic_0001>
module attributes {stable_mosaic.version = 11 : i64} {
  func.func @_resize_pad_kernel(%arg0: i32, %arg1: memref<24x16xbf16, #tpu.memory_space<vmem>>, %arg2: memref<16x48xf32, #tpu.memory_space<vmem>>, %arg3: memref<48x128xbf16, #tpu.memory_space<vmem>>, %arg4: memref<24x128xf32, #tpu.memory_space<vmem>>, %arg5: memref<24x48xf32, #tpu.memory_space<vmem>>) attributes {dimension_semantics = [#tpu.dimension_semantics<arbitrary>], iteration_bounds = array<i64: 1>, scalar_prefetch = 0 : i64, scratch_operands = 1 : i64, tpu.core_type = #tpu.core_type<tc>, window_params = [{transform_indices = @transform_0, window_bounds = array<i64: 24, 16>}, {transform_indices = @transform_1, window_bounds = array<i64: 16, 48>}, {pipeline_mode = #tpu.pipeline_mode<synchronous>, transform_indices = @transform_2, window_bounds = array<i64: 48, 128>}, {pipeline_mode = #tpu.pipeline_mode<synchronous>, transform_indices = @transform_3, window_bounds = array<i64: 24, 128>}]} {
    %c0_i32 = arith.constant 0 : i32
    %0 = arith.cmpi eq, %arg0, %c0_i32 : i32
    %1 = arith.extui %0 : i1 to i32
    %c0_i32_0 = arith.constant 0 : i32
    %2 = arith.cmpi ne, %1, %c0_i32_0 : i32
    scf.if %2 {
      %cst_10 = arith.constant 0.000000e+00 : f32
      %13 = vector.broadcast %cst_10 : f32 to vector<24x48xf32>
      %c0_11 = arith.constant 0 : index
      %c0_12 = arith.constant 0 : index
      %14 = vector.load %arg5[%c0_11, %c0_12] : memref<24x48xf32, #tpu.memory_space<vmem>>, vector<24x48xf32>
      tpu.vector_store %arg5[%c0_11, %c0_12], %13 {strides = array<i32>} : memref<24x48xf32, #tpu.memory_space<vmem>>, vector<24x48xf32>,
    } else {
    }
    %c0 = arith.constant 0 : index
    %c0_1 = arith.constant 0 : index
    %3 = vector.load %arg2[%c0, %c0_1] : memref<16x48xf32, #tpu.memory_space<vmem>>, vector<16x48xf32>
    %4 = arith.truncf %3 : vector<16x48xf32> to vector<16x48xbf16>
    %c0_2 = arith.constant 0 : index
    %c0_3 = arith.constant 0 : index
    %5 = vector.load %arg5[%c0_2, %c0_3] : memref<24x48xf32, #tpu.memory_space<vmem>>, vector<24x48xf32>
    %c0_4 = arith.constant 0 : index
    %c0_5 = arith.constant 0 : index
    %6 = vector.load %arg1[%c0_4, %c0_5] : memref<24x16xbf16, #tpu.memory_space<vmem>>, vector<24x16xbf16>
    %cst = arith.constant dense<0.000000e+00> : vector<24x48xf32>
    %7 = tpu.matmul %6, %4, %cst {dimension_numbers = #tpu.dot_dimension_numbers<[1], [0], [0], [1], [0, 0, 1, 1], [], []>} : vector<24x16xbf16>, vector<16x48xbf16>, vector<24x48xf32> -> vector<24x48xf32>
    %8 = arith.addf %5, %7 : vector<24x48xf32>
    %c0_6 = arith.constant 0 : index
    %c0_7 = arith.constant 0 : index
    %9 = vector.load %arg5[%c0_6, %c0_7] : memref<24x48xf32, #tpu.memory_space<vmem>>, vector<24x48xf32>
    tpu.vector_store %arg5[%c0_6, %c0_7], %8 {strides = array<i32>} : memref<24x48xf32, #tpu.memory_space<vmem>>, vector<24x48xf32>,
    %c0_i32_8 = arith.constant 0 : i32
    %10 = arith.cmpi eq, %arg0, %c0_i32_8 : i32
    %11 = arith.extui %10 : i1 to i32
    %c0_i32_9 = arith.constant 0 : i32
    %12 = arith.cmpi ne, %11, %c0_i32_9 : i32
    scf.if %12 {
      %c0_10 = arith.constant 0 : index
      %c0_11 = arith.constant 0 : index
      %13 = vector.load %arg5[%c0_10, %c0_11] : memref<24x48xf32, #tpu.memory_space<vmem>>, vector<24x48xf32>
      %14 = arith.truncf %13 : vector<24x48xf32> to vector<24x48xbf16>
      %c0_12 = arith.constant 0 : index
      %c0_13 = arith.constant 0 : index
      %15 = vector.load %arg3[%c0_12, %c0_13] : memref<48x128xbf16, #tpu.memory_space<vmem>>, vector<48x128xbf16>
      %cst_14 = arith.constant dense<0.000000e+00> : vector<24x128xf32>
      %16 = tpu.matmul %14, %15, %cst_14 {dimension_numbers = #tpu.dot_dimension_numbers<[1], [0], [0], [1], [0, 0, 1, 1], [], []>} : vector<24x48xbf16>, vector<48x128xbf16>, vector<24x128xf32> -> vector<24x128xf32>
      %c0_15 = arith.constant 0 : index
      %c0_16 = arith.constant 0 : index
      %17 = vector.load %arg4[%c0_15, %c0_16] : memref<24x128xf32, #tpu.memory_space<vmem>>, vector<24x128xf32>
      tpu.vector_store %arg4[%c0_15, %c0_16], %16 {strides = array<i32>} : memref<24x128xf32, #tpu.memory_space<vmem>>, vector<24x128xf32>,
    } else {
    }
    return
  }
  func.func @transform_0(%arg0: i32) -> (i32, i32) {
    %c0_i32 = arith.constant 0 : i32
    %c0_i32_0 = arith.constant 0 : i32
    return %c0_i32, %arg0 : i32, i32
  }
  func.func @transform_1(%arg0: i32) -> (i32, i32) {
    %c0_i32 = arith.constant 0 : i32
    %c0_i32_0 = arith.constant 0 : i32
    return %arg0, %c0_i32 : i32, i32
  }
  func.func @transform_2(%arg0: i32) -> (i32, i32) {
    %c0_i32 = arith.constant 0 : i32
    %c0_i32_0 = arith.constant 0 : i32
    %c0_i32_1 = arith.constant 0 : i32
    return %c0_i32, %c0_i32_0 : i32, i32
  }
  func.func @transform_3(%arg0: i32) -> (i32, i32) {
    %c0_i32 = arith.constant 0 : i32
    %c0_i32_0 = arith.constant 0 : i32
    %c0_i32_1 = arith.constant 0 : i32
    return %c0_i32, %c0_i32_0 : i32, i32
  }
}

module attributes {stable_mosaic.version = 11 : i64} {
  func.func @_resize_pad_kernel(%arg0: i32, %arg1: memref<24x16xbf16, #tpu.memory_space<vmem>>, %arg2: memref<16x48xf32, #tpu.memory_space<vmem>>, %arg3: memref<48x128xbf16, #tpu.memory_space<vmem>>, %arg4: memref<24x128xf32, #tpu.memory_space<vmem>>, %arg5: memref<24x48xf32, #tpu.memory_space<vmem>>) attributes {dimension_semantics = [#tpu.dimension_semantics<arbitrary>], iteration_bounds = array<i64: 1>, scalar_prefetch = 0 : i64, scratch_operands = 1 : i64, tpu.core_type = #tpu.core_type<tc>, window_params = [{transform_indices = @transform_0, window_bounds = array<i64: 24, 16>}, {transform_indices = @transform_1, window_bounds = array<i64: 16, 48>}, {pipeline_mode = #tpu.pipeline_mode<synchronous>, transform_indices = @transform_2, window_bounds = array<i64: 48, 128>}, {pipeline_mode = #tpu.pipeline_mode<synchronous>, transform_indices = @transform_3, window_bounds = array<i64: 24, 128>}]} {
    %c0_i32 = arith.constant 0 : i32
    %0 = arith.cmpi eq, %arg0, %c0_i32 : i32
    %1 = arith.extui %0 : i1 to i32
    %c0_i32_0 = arith.constant 0 : i32
    %2 = arith.cmpi ne, %1, %c0_i32_0 : i32
    scf.if %2 {
      %cst_10 = arith.constant 0.000000e+00 : f32
      %13 = vector.broadcast %cst_10 : f32 to vector<24x48xf32>
      %c0_11 = arith.constant 0 : index
      %c0_12 = arith.constant 0 : index
      %14 = vector.load %arg5[%c0_11, %c0_12] : memref<24x48xf32, #tpu.memory_space<vmem>>, vector<24x48xf32>
      tpu.vector_store %arg5[%c0_11, %c0_12], %13 {strides = array<i32>} : memref<24x48xf32, #tpu.memory_space<vmem>>, vector<24x48xf32>,
    } else {
    }
    %c0 = arith.constant 0 : index
    %c0_1 = arith.constant 0 : index
    %3 = vector.load %arg2[%c0, %c0_1] : memref<16x48xf32, #tpu.memory_space<vmem>>, vector<16x48xf32>
    %4 = arith.truncf %3 : vector<16x48xf32> to vector<16x48xbf16>
    %c0_2 = arith.constant 0 : index
    %c0_3 = arith.constant 0 : index
    %5 = vector.load %arg5[%c0_2, %c0_3] : memref<24x48xf32, #tpu.memory_space<vmem>>, vector<24x48xf32>
    %c0_4 = arith.constant 0 : index
    %c0_5 = arith.constant 0 : index
    %6 = vector.load %arg1[%c0_4, %c0_5] : memref<24x16xbf16, #tpu.memory_space<vmem>>, vector<24x16xbf16>
    %cst = arith.constant dense<0.000000e+00> : vector<24x48xf32>
    %7 = tpu.matmul %6, %4, %cst {dimension_numbers = #tpu.dot_dimension_numbers<[1], [0], [0], [1], [0, 0, 1, 1], [], []>} : vector<24x16xbf16>, vector<16x48xbf16>, vector<24x48xf32> -> vector<24x48xf32>
    %8 = arith.addf %5, %7 : vector<24x48xf32>
    %c0_6 = arith.constant 0 : index
    %c0_7 = arith.constant 0 : index
    %9 = vector.load %arg5[%c0_6, %c0_7] : memref<24x48xf32, #tpu.memory_space<vmem>>, vector<24x48xf32>
    tpu.vector_store %arg5[%c0_6, %c0_7], %8 {strides = array<i32>} : memref<24x48xf32, #tpu.memory_space<vmem>>, vector<24x48xf32>,
    %c0_i32_8 = arith.constant 0 : i32
    %10 = arith.cmpi eq, %arg0, %c0_i32_8 : i32
    %11 = arith.extui %10 : i1 to i32
    %c0_i32_9 = arith.constant 0 : i32
    %12 = arith.cmpi ne, %11, %c0_i32_9 : i32
    scf.if %12 {
      %c0_10 = arith.constant 0 : index
      %c0_11 = arith.constant 0 : index
      %13 = vector.load %arg5[%c0_10, %c0_11] : memref<24x48xf32, #tpu.memory_space<vmem>>, vector<24x48xf32>
      %14 = arith.truncf %13 : vector<24x48xf32> to vector<24x48xbf16>
      %c0_12 = arith.constant 0 : index
      %c0_13 = arith.constant 0 : index
      %15 = vector.load %arg3[%c0_12, %c0_13] : memref<48x128xbf16, #tpu.memory_space<vmem>>, vector<48x128xbf16>
      %cst_14 = arith.constant dense<0.000000e+00> : vector<24x128xf32>
      %16 = tpu.matmul %14, %15, %cst_14 {dimension_numbers = #tpu.dot_dimension_numbers<[1], [0], [0], [1], [0, 0, 1, 1], [], []>} : vector<24x48xbf16>, vector<48x128xbf16>, vector<24x128xf32> -> vector<24x128xf32>
      %c0_15 = arith.constant 0 : index
      %c0_16 = arith.constant 0 : index
      %17 = vector.load %arg4[%c0_15, %c0_16] : memref<24x128xf32, #tpu.memory_space<vmem>>, vector<24x128xf32>
      tpu.vector_store %arg4[%c0_15, %c0_16], %16 {strides = array<i32>} : memref<24x128xf32, #tpu.memory_space<vmem>>, vector<24x128xf32>,
    } else {
    }
    return
  }
  func.func @transform_0(%arg0: i32) -> (i32, i32) {
    %c0_i32 = arith.constant 0 : i32
    %c0_i32_0 = arith.constant 0 : i32
    return %c0_i32, %arg0 : i32, i32
  }
  func.func @transform_1(%arg0: i32) -> (i32, i32) {
    %c0_i32 = arith.constant 0 : i32
    %c0_i32_0 = arith.constant 0 : i32
    return %arg0, %c0_i32 : i32, i32
  }
  func.func @transform_2(%arg0: i32) -> (i32, i32) {
    %c0_i32 = arith.constant 0 : i32
    %c0_i32_0 = arith.constant 0 : i32
    %c0_i32_1 = arith.constant 0 : i32
    return %c0_i32, %c0_i32_0 : i32, i32
  }
  func.func @transform_3(%arg0: i32) -> (i32, i32) {
    %c0_i32 = arith.constant 0 : i32
    %c0_i32_0 = arith.constant 0 : i32
    %c0_i32_1 = arith.constant 0 : i32
    return %c0_i32, %c0_i32_0 : i32, i32
  }
}

</mosaic_0001>

<bundles_post_ra>
// kernel: tpu_custom_call.1
= control target key start
LH: loop header
LB: loop body
LE: loop exit
PB: predicated region body
PF: predicated region fallthrough
CT: control target
= control target key end

     0   :  { %8 = vsyncpa [#allocation4], 0  ;;  %s365_s0 = inlined_call_operand.vmem [shape: bf16[24,16], index: 0, kind: input, shape index: {}]   ;;  %s366_s1 = inlined_call_operand.vmem [shape: f32[16,48], index: 1, kind: input, shape index: {}]   ;;  %s367_s2 = inlined_call_operand.hbm [shape: bf16[48,128], index: 2, kind: input, shape index: {}]   ;;  %s368_s3 = inlined_call_operand.hbm [shape: f32[24,128], index: 3, kind: output, shape index: {}]  }
   0x1   :  { %9 = vsyncpa [#allocation5], 0  ;;  %s312_s12 = smov [#allocation3]  }
   0x2   :  { %s19_s13 = sshll.u32 %s312_s12, 4  ;;  %s20_s13 = int_to_ptr.vmem [resolvable:$true] %s19_s13 }
   0x3   :  { %s276_s14 = scalar_lea.vmem %s20_s13, 384  ;;  %p281_p1 = scmp.lt.s32.totalorder %s20_s13, %s20_s13 }
   0x4   :  { %p277_p0 = scmp.ne.s32.totalorder %s20_s13, %s276_s14  ;;  %p282_p2 = scmp.lt.s32.totalorder %s276_s14, %s276_s14 }
   0x6   :  { %p283_p3 = por %p282_p2, %p281_p1 }
   0x8   :  { %p284_p4 = pnand %p283_p3, %p277_p0 }
   0xa   :  { %287 = shalt.err (!%p284_p4)
}
   0xb   :  { %s313_s15 = smov 64   ;;  %s314_s16 = smov 4  }
   0xc   :  { %25 = dma.hbm_to_vmem [thread:$0]  %s367_s2, 384, %s20_s13, [#allocation4], %s313_s15, %s313_s15, %s314_s16  }
   0xd   :  { %308 = dma.done.wait [#allocation4], 384  }
   0xe   :  { %309 = vsyncadd [#allocation4], 4294966912  ;;  %vm34_vm0 = vcmask 392192   ;;  %v315_v0 = vmov 0.0   ;;  %v38_v1 = vld [vmem:[%s366_s1] sm:$0xff]  ;;  %v39_v2 = vld [vmem:[%s366_s1 + $0x8] sm:$0xff] }
   0xf   :  { %37 = vst.msk [vmem:[#allocation2 + $0x10] sm:$0xff] %vm34_vm0, %v315_v0  ;;  %35 = vst.msk [vmem:[#allocation2] sm:$0xff] %vm34_vm0, %v315_v0  ;;  %vm55_vm1 = vcmask 130048   ;;  %v40_v3 = vpack.c.bf16 %v39_v2, %v38_v1  ;;  %v263_v4 = vld [vmem:[%s365_s0] sm:$0xff]   ;;  %v264_v5 = vld [vmem:[%s365_s0 + $0x8] ss:$0 sps:$4 sm:$0xff]  }
  0x10   :  { %36 = vst.msk [vmem:[#allocation2 + $0x8] sm:$0xff] %vm34_vm0, %v315_v0  ;;  %242 = vmatprep.mubr.msk.bf16.mxu0 %vm55_vm1, %v263_v4  ;;  %v265_v6 = vld [vmem:[#allocation3 + $0x10] sm:$0xff]   ;;  %v266_v7 = vld [vmem:[#allocation3 + $0x8] sm:$0xff]   ;;  %v267_v8 = vld [vmem:[#allocation3] sm:$0xff]   ;;  %s316_s0 = smov [#allocation6]  }
  0x11   :  { %240 = vmatprep.subr.bf16.mxu0 %v40_v3  ;;  %246 = vmatprep.subr.bf16.mxu1 %v265_v6  ;;  %s211_s1 = sshll.u32 %s316_s0, 4  ;;  %s212_s1 = int_to_ptr.vmem [resolvable:$true] %s211_s1 }
  0x12   :  { %241 = vmatpush3.bf16.msra.mxu0 %v40_v3  ;;  %247 = vmatpush3.bf16.msra.mxu1 %v265_v6  ;;  %s288_s26 = scalar_lea.vmem %s212_s1, 384  ;;  %p293_p6 = scmp.lt.s32.totalorder %s212_s1, %s212_s1 }
  0x13   :  { %248 = vmatprep.subr.bf16.mxu1 %v266_v7  ;;  %p289_p5 = scmp.ne.s32.totalorder %s212_s1, %s288_s26  ;;  %p294_p7 = scmp.lt.s32.totalorder %s288_s26, %s288_s26 }
  0x15   :  { %243 = vmatmul.mubr.msk.bf16.vlgmr.msra.gmra.mxu0 %vm55_vm1, %v264_v5  ;;  %p295_p8 = por %p294_p7, %p293_p6 }
  0x16   :  { %249 = vmatpush3.bf16.msra.mxu1 %v266_v7  ;;  %v43_v9 = vld [vmem:[#allocation2 + $0x10] sm:$0xff]  ;;  %v41_v11 = vld [vmem:[#allocation2] sm:$0xff] }
  0x17   :  { %250 = vmatprep.subr.bf16.mxu1 %v267_v8  ;;  %v42_v16 = vld [vmem:[#allocation2 + $0x8] sm:$0xff]  ;;  %p296_p9 = pnand %p295_p8, %p289_p5 }
  0x1a   :  { %251 = vmatpush3.bf16.msra.mxu1 %v267_v8 }
  0xd5   :  { %v244_v10 = vpop.f32.mrf.mxu0 }
  0xd6   :  { %v112_v12 = vadd.f32 %v244_v10, %v43_v9 }
  0xd7   :  { %v96_v13 = vpop.f32.mrf.mxu0 }
  0xd8   :  { %116 = vst.msk [vmem:[#allocation2 + $0x10] sm:$0xff] %vm34_vm0, %v112_v12  ;;  %v110_v14 = vadd.f32 %v96_v13, %v41_v11 }
  0xd9   :  { %v245_v15 = vpop.f32.mrf.mxu0 }
  0xda   :  { %114 = vst.msk [vmem:[#allocation2] sm:$0xff] %vm34_vm0, %v110_v14 }
  0xdb   :  { %v99_v17 = vpop.f32.mrf.mxu0 }
  0xdc   :  { %v111_v18 = vadd.f32 %v99_v17, %v42_v16 }
  0xde   :  { %115 = vst.msk [vmem:[#allocation2 + $0x8] sm:$0xff] %vm34_vm0, %v111_v18 }
  0xdf   :  { %v122_v19 = vld [vmem:[#allocation2 + $0x10] sm:$0xff] }
  0xe0   :  { %v124_v23 = vpack.c.bf16 %v122_v19, %v122_v19 }
  0xe1   :  { %v120_v20 = vld [vmem:[#allocation2] sm:$0xff] }
  0xe5   :  { %v121_v21 = vld [vmem:[#allocation2 + $0x8] sm:$0xff] }
  0xe6   :  { %v123_v22 = vpack.c.bf16 %v121_v21, %v120_v20 }
  0xe8   :  { %252 = vmatprep.mubr.msk.bf16.mxu1 %vm34_vm0, %v123_v22 }
  0xe9   :  { %253 = vmatmul.mubr.msk.bf16.vlgmr.msra.gmra.mxu1 %vm34_vm0, %v124_v23 }
 0x1a9   :  { %v254_v24 = vpop.f32.mrf.mxu1 }
 0x1aa   :  { %205 = vst [vmem:[#allocation6 + $0x10] sm:$0xff] %v254_v24 }
 0x1ab   :  { %v189_v25 = vpop.f32.mrf.mxu1 }
 0x1ac   :  { %203 = vst [vmem:[#allocation6] sm:$0xff] %v189_v25 }
 0x1ad   :  { %v255_v26 = vpop.f32.mrf.mxu1 }
 0x1af   :  { %v192_v27 = vpop.f32.mrf.mxu1 }
 0x1b0   :  { %204 = vst [vmem:[#allocation6 + $0x8] sm:$0xff] %v192_v27 }
 0x1b1   :  { %299 = shalt.err (!%p296_p9)
}
 0x1b2   :  { %s317_s27 = smov 128   ;;  %s318_s28 = smov 8  }
 0x1b3   :  { %217 = dma.vmem_to_hbm [thread:$0]  %s212_s1, 384, %s368_s3, [#allocation5], %s317_s27, %s317_s27, %s318_s28  }
 0x1b4   :  { %310 = dma.done.wait [#allocation5], 384  }
 0x1b5   :  { %311 = vsyncadd [#allocation5], 4294966912 }
 0x1b6   :  { %221 = vsyncpa [#allocation4], 1 }
 0x1b7   :  { %222 = vsyncpa [#allocation5], 1 }

// kernel: tpu_custom_call.1
= control target key start
LH: loop header
LB: loop body
LE: loop exit
PB: predicated region body
PF: predicated region fallthrough
CT: control target
= control target key end

     0   :  { %8 = vsyncpa [#allocation4], 0  ;;  %s365_s0 = inlined_call_operand.vmem [shape: bf16[24,16], index: 0, kind: input, shape index: {}]   ;;  %s366_s1 = inlined_call_operand.vmem [shape: f32[16,48], index: 1, kind: input, shape index: {}]   ;;  %s367_s2 = inlined_call_operand.hbm [shape: bf16[48,128], index: 2, kind: input, shape index: {}]   ;;  %s368_s3 = inlined_call_operand.hbm [shape: f32[24,128], index: 3, kind: output, shape index: {}]  }
   0x1   :  { %9 = vsyncpa [#allocation5], 0  ;;  %s312_s12 = smov [#allocation3]  }
   0x2   :  { %s19_s13 = sshll.u32 %s312_s12, 4  ;;  %s20_s13 = int_to_ptr.vmem [resolvable:$true] %s19_s13 }
   0x3   :  { %s276_s14 = scalar_lea.vmem %s20_s13, 384  ;;  %p281_p1 = scmp.lt.s32.totalorder %s20_s13, %s20_s13 }
   0x4   :  { %p277_p0 = scmp.ne.s32.totalorder %s20_s13, %s276_s14  ;;  %p282_p2 = scmp.lt.s32.totalorder %s276_s14, %s276_s14 }
   0x6   :  { %p283_p3 = por %p282_p2, %p281_p1 }
   0x8   :  { %p284_p4 = pnand %p283_p3, %p277_p0 }
   0xa   :  { %287 = shalt.err (!%p284_p4)
}
   0xb   :  { %s313_s15 = smov 64   ;;  %s314_s16 = smov 4  }
   0xc   :  { %25 = dma.hbm_to_vmem [thread:$0]  %s367_s2, 384, %s20_s13, [#allocation4], %s313_s15, %s313_s15, %s314_s16  }
   0xd   :  { %308 = dma.done.wait [#allocation4], 384  }
   0xe   :  { %309 = vsyncadd [#allocation4], 4294966912  ;;  %vm34_vm0 = vcmask 392192   ;;  %v315_v0 = vmov 0.0   ;;  %v38_v1 = vld [vmem:[%s366_s1] sm:$0xff]  ;;  %v39_v2 = vld [vmem:[%s366_s1 + $0x8] sm:$0xff] }
   0xf   :  { %37 = vst.msk [vmem:[#allocation2 + $0x10] sm:$0xff] %vm34_vm0, %v315_v0  ;;  %35 = vst.msk [vmem:[#allocation2] sm:$0xff] %vm34_vm0, %v315_v0  ;;  %vm55_vm1 = vcmask 130048   ;;  %v40_v3 = vpack.c.bf16 %v39_v2, %v38_v1  ;;  %v263_v4 = vld [vmem:[%s365_s0] sm:$0xff]   ;;  %v264_v5 = vld [vmem:[%s365_s0 + $0x8] ss:$0 sps:$4 sm:$0xff]  }
  0x10   :  { %36 = vst.msk [vmem:[#allocation2 + $0x8] sm:$0xff] %vm34_vm0, %v315_v0  ;;  %242 = vmatprep.mubr.msk.bf16.mxu0 %vm55_vm1, %v263_v4  ;;  %v265_v6 = vld [vmem:[#allocation3 + $0x10] sm:$0xff]   ;;  %v266_v7 = vld [vmem:[#allocation3 + $0x8] sm:$0xff]   ;;  %v267_v8 = vld [vmem:[#allocation3] sm:$0xff]   ;;  %s316_s0 = smov [#allocation6]  }
  0x11   :  { %240 = vmatprep.subr.bf16.mxu0 %v40_v3  ;;  %246 = vmatprep.subr.bf16.mxu1 %v265_v6  ;;  %s211_s1 = sshll.u32 %s316_s0, 4  ;;  %s212_s1 = int_to_ptr.vmem [resolvable:$true] %s211_s1 }
  0x12   :  { %241 = vmatpush3.bf16.msra.mxu0 %v40_v3  ;;  %247 = vmatpush3.bf16.msra.mxu1 %v265_v6  ;;  %s288_s26 = scalar_lea.vmem %s212_s1, 384  ;;  %p293_p6 = scmp.lt.s32.totalorder %s212_s1, %s212_s1 }
  0x13   :  { %248 = vmatprep.subr.bf16.mxu1 %v266_v7  ;;  %p289_p5 = scmp.ne.s32.totalorder %s212_s1, %s288_s26  ;;  %p294_p7 = scmp.lt.s32.totalorder %s288_s26, %s288_s26 }
  0x15   :  { %243 = vmatmul.mubr.msk.bf16.vlgmr.msra.gmra.mxu0 %vm55_vm1, %v264_v5  ;;  %p295_p8 = por %p294_p7, %p293_p6 }
  0x16   :  { %249 = vmatpush3.bf16.msra.mxu1 %v266_v7  ;;  %v43_v9 = vld [vmem:[#allocation2 + $0x10] sm:$0xff]  ;;  %v41_v11 = vld [vmem:[#allocation2] sm:$0xff] }
  0x17   :  { %250 = vmatprep.subr.bf16.mxu1 %v267_v8  ;;  %v42_v16 = vld [vmem:[#allocation2 + $0x8] sm:$0xff]  ;;  %p296_p9 = pnand %p295_p8, %p289_p5 }
  0x1a   :  { %251 = vmatpush3.bf16.msra.mxu1 %v267_v8 }
  0xd5   :  { %v244_v10 = vpop.f32.mrf.mxu0 }
  0xd6   :  { %v112_v12 = vadd.f32 %v244_v10, %v43_v9 }
  0xd7   :  { %v96_v13 = vpop.f32.mrf.mxu0 }
  0xd8   :  { %116 = vst.msk [vmem:[#allocation2 + $0x10] sm:$0xff] %vm34_vm0, %v112_v12  ;;  %v110_v14 = vadd.f32 %v96_v13, %v41_v11 }
  0xd9   :  { %v245_v15 = vpop.f32.mrf.mxu0 }
  0xda   :  { %114 = vst.msk [vmem:[#allocation2] sm:$0xff] %vm34_vm0, %v110_v14 }
  0xdb   :  { %v99_v17 = vpop.f32.mrf.mxu0 }
  0xdc   :  { %v111_v18 = vadd.f32 %v99_v17, %v42_v16 }
  0xde   :  { %115 = vst.msk [vmem:[#allocation2 + $0x8] sm:$0xff] %vm34_vm0, %v111_v18 }
  0xdf   :  { %v122_v19 = vld [vmem:[#allocation2 + $0x10] sm:$0xff] }
  0xe0   :  { %v124_v23 = vpack.c.bf16 %v122_v19, %v122_v19 }
  0xe1   :  { %v120_v20 = vld [vmem:[#allocation2] sm:$0xff] }
  0xe5   :  { %v121_v21 = vld [vmem:[#allocation2 + $0x8] sm:$0xff] }
  0xe6   :  { %v123_v22 = vpack.c.bf16 %v121_v21, %v120_v20 }
  0xe8   :  { %252 = vmatprep.mubr.msk.bf16.mxu1 %vm34_vm0, %v123_v22 }
  0xe9   :  { %253 = vmatmul.mubr.msk.bf16.vlgmr.msra.gmra.mxu1 %vm34_vm0, %v124_v23 }
 0x1a9   :  { %v254_v24 = vpop.f32.mrf.mxu1 }
 0x1aa   :  { %205 = vst [vmem:[#allocation6 + $0x10] sm:$0xff] %v254_v24 }
 0x1ab   :  { %v189_v25 = vpop.f32.mrf.mxu1 }
 0x1ac   :  { %203 = vst [vmem:[#allocation6] sm:$0xff] %v189_v25 }
 0x1ad   :  { %v255_v26 = vpop.f32.mrf.mxu1 }
 0x1af   :  { %v192_v27 = vpop.f32.mrf.mxu1 }
 0x1b0   :  { %204 = vst [vmem:[#allocation6 + $0x8] sm:$0xff] %v192_v27 }
 0x1b1   :  { %299 = shalt.err (!%p296_p9)
}
 0x1b2   :  { %s317_s27 = smov 128   ;;  %s318_s28 = smov 8  }
 0x1b3   :  { %217 = dma.vmem_to_hbm [thread:$0]  %s212_s1, 384, %s368_s3, [#allocation5], %s317_s27, %s317_s27, %s318_s28  }
 0x1b4   :  { %310 = dma.done.wait [#allocation5], 384  }
 0x1b5   :  { %311 = vsyncadd [#allocation5], 4294966912 }
 0x1b6   :  { %221 = vsyncpa [#allocation4], 1 }
 0x1b7   :  { %222 = vsyncpa [#allocation5], 1 }

</bundles_post_ra>
